<compile_context>
chip_gen: v7x
topology: tpu7x:2x2x1
jax: 0.10.0
libtpu: 0.0.40
codegen_flags: <defaults>
</compile_context>

<pallas_src>
import jax
import jax.numpy as jnp
from jax.experimental import pallas as pl
from jax.experimental.pallas import tpu as pltpu


def linear_kernel(x_ref, w_ref, b_ref, o_ref):
    # x_ref: (TB, N) VMEM, w_ref: (1, N) VMEM, b_ref: (1,) SMEM, o_ref: (1, TB) VMEM
    x = x_ref[...].astype(jnp.float32)          # f32 accumulation regardless of input dtype
    w = w_ref[...].astype(jnp.float32)          # (1, N) broadcasts over rows
    b = b_ref[0].astype(jnp.float32)            # scalar bias from SMEM
    # VPU multiply + lane reduction: one dot product per row (MXU would waste
    # >87% of the array at K=32, N_out=1).  Bias added before the relayout.
    sums = jnp.sum(x * w, axis=-1) + b          # (TB,)
    # Lane-dense store: batch sits on the 128-lane axis of the output block.
    o_ref[...] = sums[None, :].astype(o_ref.dtype)


def _round_up(v, m):
    return -(-v // m) * m


def _batch_tile(B, N, itemsize, target_bytes):
    """Rows per grid step: ~target_bytes of x per buffer, multiple of 128."""
    tb = (target_bytes // (N * itemsize)) // 128 * 128
    tb = max(tb, 128)
    if B > tb:
        # Guarantee >= 2 grid steps so the "parallel" batch axis can shard
        # across v7x's two TensorCores (irrelevant on single-TC v5e/v6e).
        tb = min(tb, _round_up(_round_up(B, 2) // 2, 128))
    return tb


def olayer_forward(x, weight, bias, *, target_block_bytes=4 << 20,
                   force_pallas=False):
    """x: (B, N), weight: (1, N) (PyTorch Linear layout), bias: (1,) -> (B, 1)."""
    B, N = x.shape
    itemsize = jnp.dtype(x.dtype).itemsize

    # Tiny GEMV: let XLA fuse it — a pallas_call launch + one grid step would
    # dominate by orders of magnitude.  The Pallas path pays off at large B.
    if not force_pallas and B * N * itemsize < (1 << 20):
        return (jnp.sum(x.astype(jnp.float32) * weight.astype(jnp.float32),
                        axis=-1, keepdims=True)
                + bias.astype(jnp.float32)).astype(x.dtype)

    tb = _batch_tile(B, N, itemsize, target_block_bytes)
    if B <= tb:
        tb = B                      # single full-extent block, no padding rules needed
    grid = (pl.cdiv(B, tb),)        # partial tail block handled by Pallas bounds checks

    out_row = pl.pallas_call(
        linear_kernel,
        out_shape=jax.ShapeDtypeStruct((1, B), x.dtype),
        grid_spec=pltpu.PrefetchScalarGridSpec(
            num_scalar_prefetch=0,
            grid=grid,
            in_specs=[
                # x: tile only the batch axis; weight stays fully resident.
                pl.BlockSpec((tb, N), lambda i: (i, 0)),
                pl.BlockSpec((1, N), lambda i: (0, 0)),
                # bias: scalar in SMEM (no padded (1,1) VMEM vreg tile).
                pl.BlockSpec(memory_space=pltpu.MemorySpace.SMEM),
            ],
            out_specs=pl.BlockSpec((1, tb), lambda i: (0, i)),
        ),
        compiler_params=pltpu.CompilerParams(
            dimension_semantics=("parallel",),
            # ~2x(tb*N*4) for double-buffered x + 2x(tb*4) output << 32 MiB;
            # explicit so the enlarged tile compiles on v5e/v6e/v7x alike.
            vmem_limit_bytes=32 * 1024 * 1024,
        ),
    )(x, weight, bias)

    # (1, B) lane-dense kernel output -> (B, 1) to match nn.Linear(n, 1).
    # (Downstream code that accepts (B,) could skip this relayout.)
    return out_row.reshape(B, 1)


if __name__ == "__main__":
    key = jax.random.PRNGKey(0)
    kx, kw, kb, kx2 = jax.random.split(key, 4)

    N = 32  # dataset.args.n

    # Deterministic param init mimicking nn.Linear(N, 1):
    # weight, bias ~ U(-1/sqrt(N), 1/sqrt(N))
    bound = 1.0 / jnp.sqrt(jnp.float32(N))
    weight = jax.random.uniform(kw, (1, N), dtype=jnp.float32,
                                minval=-bound, maxval=bound)
    bias = jax.random.uniform(kb, (1,), dtype=jnp.float32,
                              minval=-bound, maxval=bound)

    # Small demo shape (batch=8, n=32); force the Pallas path to exercise it.
    B = 8
    x = jax.random.normal(kx, (B, N), dtype=jnp.float32)
    out = jax.block_until_ready(olayer_forward(x, weight, bias, force_pallas=True))
    ref = jnp.sum(x * weight, axis=-1, keepdims=True) + bias
    assert out.shape == (B, 1)
    assert jnp.allclose(out, ref, atol=1e-5, rtol=1e-5)

    # Larger, non-divisible batch: exercises cdiv gridding, the partial tail
    # block and the >=2-step parallel grid (dual-core sharding on v7x).
    B2 = 33000
    x2 = jax.random.normal(kx2, (B2, N), dtype=jnp.float32)
    out2 = jax.block_until_ready(olayer_forward(x2, weight, bias))
    ref2 = jnp.sum(x2 * weight, axis=-1, keepdims=True) + bias
    assert out2.shape == (B2, 1)
    assert jnp.allclose(out2, ref2, atol=1e-5, rtol=1e-5)

    print("KERNEL_OK")
</pallas_src>

<mosaic_0001>
module attributes {stable_mosaic.version = 11 : i64} {
  func.func @linear_kernel(%arg0: i32, %arg1: memref<8x32xf32, #tpu.memory_space<vmem>>, %arg2: memref<1x32xf32, #tpu.memory_space<vmem>>, %arg3: memref<1xf32, #tpu.memory_space<smem>>, %arg4: memref<1x8xf32, #tpu.memory_space<vmem>>) attributes {dimension_semantics = [#tpu.dimension_semantics<parallel>], iteration_bounds = array<i64: 1>, scalar_prefetch = 0 : i64, scratch_operands = 0 : i64, tpu.core_type = #tpu.core_type<tc>, window_params = [{transform_indices = @transform_0, window_bounds = array<i64: 8, 32>}, {pipeline_mode = #tpu.pipeline_mode<synchronous>, transform_indices = @transform_1, window_bounds = array<i64: 1, 32>}, {transform_indices = @transform_2, window_bounds = array<i64: 1>}, {transform_indices = @transform_3, window_bounds = array<i64: 1, 8>}]} {
    %c0 = arith.constant 0 : index
    %c0_0 = arith.constant 0 : index
    %0 = vector.load %arg1[%c0, %c0_0] : memref<8x32xf32, #tpu.memory_space<vmem>>, vector<8x32xf32>
    %c0_1 = arith.constant 0 : index
    %c0_2 = arith.constant 0 : index
    %1 = vector.load %arg2[%c0_1, %c0_2] : memref<1x32xf32, #tpu.memory_space<vmem>>, vector<1x32xf32>
    %c0_3 = arith.constant 0 : index
    %2 = memref.load %arg3[%c0_3] : memref<1xf32, #tpu.memory_space<smem>>
    %3 = vector.broadcast %1 : vector<1x32xf32> to vector<8x32xf32>
    %4 = arith.mulf %0, %3 : vector<8x32xf32>
    %cst = arith.constant dense<0.000000e+00> : vector<8xf32>
    %5 = vector.multi_reduction <add>, %4, %cst [1] : vector<8x32xf32> to vector<8xf32>
    %6 = vector.broadcast %2 : f32 to vector<8xf32>
    %7 = arith.addf %5, %6 : vector<8xf32>
    %8 = vector.shape_cast %7 : vector<8xf32> to vector<1x8xf32>
    %c0_4 = arith.constant 0 : index
    %c0_5 = arith.constant 0 : index
    %9 = vector.load %arg4[%c0_4, %c0_5] : memref<1x8xf32, #tpu.memory_space<vmem>>, vector<1x8xf32>
    tpu.vector_store %arg4[%c0_4, %c0_5], %8 {strides = array<i32>} : memref<1x8xf32, #tpu.memory_space<vmem>>, vector<1x8xf32>,
    return
  }
  func.func @transform_0(%arg0: i32) -> (i32, i32) {
    %c0_i32 = arith.constant 0 : i32
    %c0_i32_0 = arith.constant 0 : i32
    return %arg0, %c0_i32 : i32, i32
  }
  func.func @transform_1(%arg0: i32) -> (i32, i32) {
    %c0_i32 = arith.constant 0 : i32
    %c0_i32_0 = arith.constant 0 : i32
    %c0_i32_1 = arith.constant 0 : i32
    return %c0_i32, %c0_i32_0 : i32, i32
  }
  func.func @transform_2(%arg0: i32) -> i32 {
    %c0_i32 = arith.constant 0 : i32
    %c0_i32_0 = arith.constant 0 : i32
    return %c0_i32 : i32
  }
  func.func @transform_3(%arg0: i32) -> (i32, i32) {
    %c0_i32 = arith.constant 0 : i32
    %c0_i32_0 = arith.constant 0 : i32
    return %c0_i32, %arg0 : i32, i32
  }
}

</mosaic_0001>

<bundles_post_ra>
// kernel: tpu_custom_call.1
= control target key start
LH: loop header
LB: loop body
LE: loop exit
PB: predicated region body
PF: predicated region fallthrough
CT: control target
= control target key end

     0   :  { %9 = vsyncpa [#allocation4], 0  ;;  %s172_s0 = inlined_call_operand.hbm [shape: f32[8,32], index: 0, kind: input, shape index: {}]   ;;  %s173_s1 = inlined_call_operand.vmem [shape: f32[1,32], index: 1, kind: input, shape index: {}]   ;;  %s174_s2 = inlined_call_operand.<no memory space> [shape: f32[1], index: 2, kind: input, shape index: {}]   ;;  %s175_s3 = inlined_call_operand.hbm [shape: f32[1,8], index: 3, kind: output, shape index: {}]  }
   0x1   :  { %10 = vsyncpa [#allocation5], 0  ;;  %s120_s12 = smov [#allocation3]   ;;  %s72_s16 = scalar_lea.hbm %s172_s0, 128 }
   0x2   :  { %s17_s13 = sshll.u32 %s120_s12, 4  ;;  %p73_p0 = scmp.ne.s32.totalorder %s172_s0, %s72_s16  ;;  %s18_s13 = int_to_ptr.vmem [resolvable:$true] %s17_s13 }
   0x3   :  { %p76_p1 = scmp.lt.u32.totalorder %s72_s16, %s172_s0 }
   0x5   :  { %p78_p2 = pnand %p76_p1, %p73_p0 }
   0x7   :  { %81 = shalt.err (!%p78_p2)
}
   0x8   :  { %s82_s21 = scalar_lea.vmem %s18_s13, 128  ;;  %p87_p4 = scmp.lt.s32.totalorder %s18_s13, %s18_s13 }
   0x9   :  { %p83_p3 = scmp.ne.s32.totalorder %s18_s13, %s82_s21  ;;  %p88_p5 = scmp.lt.s32.totalorder %s82_s21, %s82_s21 }
   0xb   :  { %p89_p6 = por %p88_p5, %p87_p4 }
   0xd   :  { %p90_p7 = pnand %p89_p6, %p83_p3 }
   0xf   :  { %93 = shalt.err (!%p90_p7)
}
  0x10   :  { %20 = dma.hbm_to_vmem [thread:$0]  %s172_s0, 128, %s18_s13, [#allocation4]  }
  0x11   :  { %116 = dma.done.wait [#allocation4], 128  }
  0x12   :  { %117 = vsyncadd [#allocation4], 4294967168  ;;  %v28_v0 = vld [vmem:[#allocation3] sm:$0xff]  ;;  %vm38_vm0 = vcmask 261120   ;;  %v45_v4 = vlaneseq  ;;  %v42_v7 = vstv %s174_s2  ;;  %s121_s0 = smov [#allocation6]   ;;  %vm52_vm1 = vcmask 57344  }
  0x13   :  { %v69_v1 = vld [vmem:[%s173_s1] ss:$0 sm:$0xff]  ;;  %s60_s28 = sshll.u32 %s121_s0, 4  ;;  %s61_s28 = int_to_ptr.vmem [resolvable:$true] %s60_s28 }
  0x14   :  { %v37_v2 = vmul.f32 %v69_v1, %v28_v0  ;;  %v46_v5 = vand.u32 127, %v45_v4  ;;  %v48_v6 = vshrl.u32 %v45_v4, 7  ;;  %s94_s1 = scalar_lea.vmem %s61_s28, 16  ;;  %s98_s29 = scalar_lea.vmem %s61_s28, 32 }
  0x15   :  { %p95_p8 = scmp.ne.s32.totalorder %s61_s28, %s94_s1  ;;  %p99_p9 = scmp.lt.s32.totalorder %s61_s28, %s61_s28 }
  0x16   :  { %v39_v3 = vsel %vm38_vm0, %v37_v2, 0.0  ;;  %v49_v8 = vsub.s32 %v46_v5, %v48_v6  ;;  %p100_p10 = scmp.lt.s32.totalorder %s98_s29, %s94_s1 }
  0x17   :  { %40 = vadd.xlane.f32.xlu0 %v39_v3 }
  0x18   :  { %p101_p11 = por %p100_p10, %p99_p9 }
  0x1a   :  { %p102_p12 = pnand %p101_p11, %p95_p8 }
  0xa4   :  { %v41_v9 = vpop.xlane.xlu0 %40 }
  0xa5   :  { %v43_v10 = vadd.f32 %v42_v7, %v41_v9 }
  0xa7   :  { %v50_v11 = vrot.slane %v43_v10, %v49_v8 }
  0xa9   :  { %53 = vst.msk [vmem:[#allocation6] sm:$0x1] %vm52_vm1, %v50_v11 }
  0xaa   :  { %105 = shalt.err (!%p102_p12)
}
  0xab   :  { %s106_s2 = scalar_lea.hbm %s175_s3, 16 }
  0xac   :  { %p107_p13 = scmp.ne.s32.totalorder %s175_s3, %s106_s2  ;;  %p110_p0 = scmp.lt.u32.totalorder %s106_s2, %s175_s3 }
  0xae   :  { %p112_p1 = pnand %p110_p0, %p107_p13 }
  0xb0   :  { %115 = shalt.err (!%p112_p1)
}
  0xb1   :  { %63 = dma.vmem_to_hbm [thread:$0]  %s61_s28, 16, %s175_s3, [#allocation5]  }
  0xb2   :  { %118 = dma.done.wait [#allocation5], 16  }
  0xb3   :  { %119 = vsyncadd [#allocation5], 4294967280 }
  0xb4   :  { %67 = vsyncpa [#allocation4], 1 }
  0xb5   :  { %68 = vsyncpa [#allocation5], 1 }

</bundles_post_ra>
